<compile_context>
chip_gen: v5e
topology: v5e:2x2
jax: 0.10.0
libtpu: 0.0.40
codegen_flags: <defaults>
</compile_context>

<pallas_src>
import functools

import jax
import jax.numpy as jnp
from jax.experimental import pallas as pl
from jax.experimental.pallas import tpu as pltpu

EPS = 1e-5
ROW_ALIGN = 16            # sublane alignment (covers bf16 row packing of 16)
VMEM_CAP = 64 << 20       # never request more scoped VMEM than v7x physically has


def _round_up(n, m):
    return ((n + m - 1) // m) * m


# --------------------------------------------------------------------------- kernel

def subnet_kernel(x_ref, w1_ref, b1_ref, w2_ref, b2_ref, w3_ref, b3_ref, o_ref,
                  *, precision):
    """One (tb, Fp) row tile of x -> (tb, Hp) row tile of the output.

    x_ref is already in the matmul operand dtype; bias-add / ReLU / output stay f32.
    BN is pre-folded into W1/b1, so the body is just three MXU matmuls with epilogues.
    """
    w_dtype = w1_ref.dtype

    y = jnp.dot(x_ref[...], w1_ref[...],
                preferred_element_type=jnp.float32, precision=precision)
    y = jnp.maximum(y + b1_ref[...], 0.0)

    y = jnp.dot(y.astype(w_dtype), w2_ref[...],
                preferred_element_type=jnp.float32, precision=precision)
    y = jnp.maximum(y + b2_ref[...], 0.0)

    y = jnp.dot(y.astype(w_dtype), w3_ref[...],
                preferred_element_type=jnp.float32, precision=precision)
    y = jnp.maximum(y + b3_ref[...], 0.0)

    o_ref[...] = y.astype(o_ref.dtype)


# --------------------------------------------------------------------------- params

def init_params(key, in_size, hidden_size):
    """Raw (torch-like) parameters: BN affine + running stats, 3 linear layers."""
    ks = jax.random.split(key, 8)
    gamma = 1.0 + 0.1 * jax.random.normal(ks[0], (1, in_size), jnp.float32)
    beta = 0.1 * jax.random.normal(ks[1], (1, in_size), jnp.float32)
    running_mean = 0.1 * jax.random.normal(ks[2], (1, in_size), jnp.float32)
    running_var = jnp.abs(1.0 + 0.1 * jax.random.normal(ks[3], (1, in_size), jnp.float32))

    def linear(k, fan_in, fan_out):
        kw, kb = jax.random.split(k)
        bound = 1.0 / jnp.sqrt(fan_in)
        # Stored as (in, out)  ==  torch weight (out, in) transposed.
        w = jax.random.uniform(kw, (fan_in, fan_out), jnp.float32, -bound, bound)
        b = jax.random.uniform(kb, (1, fan_out), jnp.float32, -bound, bound)
        return w, b

    w1, b1 = linear(ks[4], in_size, hidden_size)
    w2, b2 = linear(ks[5], hidden_size, hidden_size)
    w3, b3 = linear(ks[6], hidden_size, hidden_size)

    return dict(gamma=gamma, beta=beta, running_mean=running_mean, running_var=running_var,
                w1=w1, b1=b1, w2=w2, b2=b2, w3=w3, b3=b3)


def prepare_params(raw, *, eps=EPS, matmul_dtype=jnp.bfloat16):
    """One-time prep: fold inference BN into W1/b1, pad to 128-lane multiples, cast weights."""
    in_size, hidden = raw["w1"].shape

    # BN fold:  normed = x*scale + shift  ->  normed @ W1 + b1 = x @ (scale^T * W1) + (shift @ W1 + b1)
    scale = raw["gamma"] * jax.lax.rsqrt(raw["running_var"] + eps)    # (1, F)
    shift = raw["beta"] - raw["running_mean"] * scale                  # (1, F)
    w1 = raw["w1"] * scale.T                                           # (F, H)
    b1 = raw["b1"] + jnp.dot(shift, raw["w1"],
                             precision=jax.lax.Precision.HIGHEST)      # exact fold
    w2, b2, w3, b3 = raw["w2"], raw["b2"], raw["w3"], raw["b3"]

    # Lane padding to multiples of 128 (zero pads stay zero through bias/ReLU chain).
    Fp = _round_up(in_size, 128)
    Hp = _round_up(hidden, 128)

    def pad(a, rows, cols):
        return jnp.pad(a, ((0, rows - a.shape[0]), (0, cols - a.shape[1])))

    return dict(
        w1=pad(w1, Fp, Hp).astype(matmul_dtype),
        b1=pad(b1, 1, Hp),                       # biases stay f32 (added to f32 accumulator)
        w2=pad(w2, Hp, Hp).astype(matmul_dtype),
        b2=pad(b2, 1, Hp),
        w3=pad(w3, Hp, Hp).astype(matmul_dtype),
        b3=pad(b3, 1, Hp),
        in_size=in_size, hidden=hidden, Fp=Fp, Hp=Hp,
    )


# --------------------------------------------------------------------------- tiling / VMEM

def _vmem_estimate(tb, Fp, Hp, w_bytes, x_bytes):
    weights = (Fp * Hp + 2 * Hp * Hp) * w_bytes + 3 * Hp * 4      # single-buffered weights + biases
    tiles = 2 * tb * Fp * x_bytes + 2 * tb * Hp * 4               # double-buffered x / out tiles
    interm = 3 * tb * Hp * 4                                      # y1/y2/y3 f32 temporaries
    return weights + tiles + interm


def _choose_row_tiling(B, Fp, Hp, block_rows, w_bytes, x_bytes):
    rows = _round_up(max(B, ROW_ALIGN), ROW_ALIGN)
    # Cap the tile so the estimated VMEM footprint stays comfortably under v7x's budget.
    tb_cap = _round_up(min(block_rows, rows), ROW_ALIGN)
    while tb_cap > ROW_ALIGN and _vmem_estimate(tb_cap, Fp, Hp, w_bytes, x_bytes) > (48 << 20):
        tb_cap = _round_up(tb_cap // 2, ROW_ALIGN)
    num_tiles = pl.cdiv(rows, tb_cap)
    if rows >= 2 * ROW_ALIGN:
        num_tiles = max(num_tiles, 2)            # keep both v7x TensorCores busy
    num_tiles = min(num_tiles, rows // ROW_ALIGN)
    tb = _round_up(pl.cdiv(rows, num_tiles), ROW_ALIGN)   # balanced tiles, minimal padding
    return tb, tb * num_tiles


# --------------------------------------------------------------------------- forward

@functools.partial(
    jax.jit,
    static_argnames=("tb", "Bp", "Fp", "out_rows", "out_cols", "precision", "vmem_limit"))
def _subnet_forward_impl(x, w1, b1, w2, b2, w3, b3, *,
                         tb, Bp, Fp, out_rows, out_cols, precision, vmem_limit):
    B, F = x.shape
    Hp = w1.shape[1]

    # Row/lane pad + cast to the matmul dtype; allow_input_fusion lets XLA fuse this
    # directly into the pallas_call operand (no separate padded copy in HBM).
    x_pad = jnp.pad(x, ((0, Bp - B), (0, Fp - F))).astype(w1.dtype)

    rows = lambda i: (i, 0)        # activation tiles: one row slab per grid step
    const = lambda i: (0, 0)       # weights / biases: VMEM-resident across all steps
    resident = lambda shape: pl.BlockSpec(shape, const, pipeline_mode=pl.Buffered(1))

    out = pl.pallas_call(
        functools.partial(subnet_kernel, precision=precision),
        out_shape=jax.ShapeDtypeStruct((Bp, Hp), jnp.float32),
        grid=(Bp // tb,),
        in_specs=[
            pl.BlockSpec((tb, Fp), rows),        # x tile (double-buffered)
            resident((Fp, Hp)), resident((1, Hp)),   # w1, b1 (single-buffered)
            resident((Hp, Hp)), resident((1, Hp)),   # w2, b2
            resident((Hp, Hp)), resident((1, Hp)),   # w3, b3
        ],
        out_specs=pl.BlockSpec((tb, Hp), rows),
        compiler_params=pltpu.CompilerParams(
            dimension_semantics=("parallel",),   # shard batch tiles across TensorCores
            vmem_limit_bytes=vmem_limit,
            allow_input_fusion=[True, False, False, False, False, False, False],
        ),
    )(x_pad, w1, b1, w2, b2, w3, b3)

    # TODO(synk): if downstream accepts the padded (Bp, Hp) slab, drop this slice.
    return out[:out_rows, :out_cols]


def subnet_forward(x, prepared, *, block_rows=1024):
    """x: (B, in_size) float32. prepared: output of prepare_params."""
    B, F = x.shape
    assert F == prepared["in_size"]
    Fp, Hp, H = prepared["Fp"], prepared["Hp"], prepared["hidden"]

    w_dtype = prepared["w1"].dtype
    w_bytes = jnp.dtype(w_dtype).itemsize
    tb, Bp = _choose_row_tiling(B, Fp, Hp, block_rows, w_bytes, w_bytes)
    vmem_limit = int(min(
        VMEM_CAP,
        max(16 << 20, 1.5 * _vmem_estimate(tb, Fp, Hp, w_bytes, w_bytes) + (2 << 20))))
    precision = jax.lax.Precision.HIGHEST if w_dtype == jnp.float32 else None

    return _subnet_forward_impl(
        x,
        prepared["w1"], prepared["b1"],
        prepared["w2"], prepared["b2"],
        prepared["w3"], prepared["b3"],
        tb=tb, Bp=Bp, Fp=Fp, out_rows=B, out_cols=H,
        precision=precision, vmem_limit=vmem_limit)


# --------------------------------------------------------------------------- reference

def subnet_reference(x, p):
    hi = jax.lax.Precision.HIGHEST
    normed = (x - p["running_mean"]) * jax.lax.rsqrt(p["running_var"] + EPS) * p["gamma"] + p["beta"]
    y1 = jnp.maximum(jnp.dot(normed, p["w1"], precision=hi) + p["b1"], 0.0)
    y2 = jnp.maximum(jnp.dot(y1, p["w2"], precision=hi) + p["b2"], 0.0)
    y3 = jnp.maximum(jnp.dot(y2, p["w3"], precision=hi) + p["b3"], 0.0)
    return y3


# --------------------------------------------------------------------------- test

if __name__ == "__main__":
    key = jax.random.PRNGKey(0)
    k_x1, k_x2, k_p = jax.random.split(key, 3)

    in_size, hidden_size = 20, 32      # deliberately non-128 to exercise the padding path
    raw = init_params(k_p, in_size, hidden_size)

    # f32 matmul path (precision=HIGHEST), single row tile.
    x1 = jax.random.normal(k_x1, (10, in_size), jnp.float32)
    ref1 = subnet_reference(x1, raw)
    prep_f32 = prepare_params(raw, matmul_dtype=jnp.float32)
    out1 = jax.block_until_ready(subnet_forward(x1, prep_f32))
    assert out1.shape == (10, hidden_size)
    assert jnp.allclose(out1, ref1, atol=2e-5, rtol=2e-5), "f32 Pallas output mismatch"

    # bf16 matmul-operand path (f32 accumulation) -- the default; multi-tile grid
    # (exercises the megacore-aware balanced tiling and row padding).
    x2 = jax.random.normal(k_x2, (40, in_size), jnp.float32)
    ref2 = subnet_reference(x2, raw)
    prep_bf16 = prepare_params(raw)    # matmul_dtype defaults to bf16
    out2 = jax.block_until_ready(subnet_forward(x2, prep_bf16))
    assert out2.shape == (40, hidden_size)
    assert jnp.allclose(out2, ref2, atol=5e-2, rtol=5e-2), "bf16 Pallas output mismatch"

    print("KERNEL_OK")
</pallas_src>

<mosaic_0001>
module attributes {stable_mosaic.version = 11 : i64} {
  func.func @subnet_kernel(%arg0: i32, %arg1: memref<16x128xf32, #tpu.memory_space<vmem>>, %arg2: memref<128x128xf32, #tpu.memory_space<vmem>>, %arg3: memref<1x128xf32, #tpu.memory_space<vmem>>, %arg4: memref<128x128xf32, #tpu.memory_space<vmem>>, %arg5: memref<1x128xf32, #tpu.memory_space<vmem>>, %arg6: memref<128x128xf32, #tpu.memory_space<vmem>>, %arg7: memref<1x128xf32, #tpu.memory_space<vmem>>, %arg8: memref<16x128xf32, #tpu.memory_space<vmem>>) attributes {dimension_semantics = [#tpu.dimension_semantics<parallel>], iteration_bounds = array<i64: 1>, scalar_prefetch = 0 : i64, scratch_operands = 0 : i64, tpu.core_type = #tpu.core_type<tc>, window_params = [{transform_indices = @transform_0, window_bounds = array<i64: 16, 128>}, {pipeline_mode = #tpu.pipeline_mode<synchronous>, transform_indices = @transform_1, window_bounds = array<i64: 128, 128>}, {pipeline_mode = #tpu.pipeline_mode<synchronous>, transform_indices = @transform_2, window_bounds = array<i64: 1, 128>}, {pipeline_mode = #tpu.pipeline_mode<synchronous>, transform_indices = @transform_3, window_bounds = array<i64: 128, 128>}, {pipeline_mode = #tpu.pipeline_mode<synchronous>, transform_indices = @transform_4, window_bounds = array<i64: 1, 128>}, {pipeline_mode = #tpu.pipeline_mode<synchronous>, transform_indices = @transform_5, window_bounds = array<i64: 128, 128>}, {pipeline_mode = #tpu.pipeline_mode<synchronous>, transform_indices = @transform_6, window_bounds = array<i64: 1, 128>}, {transform_indices = @transform_7, window_bounds = array<i64: 16, 128>}]} {
    %c0 = arith.constant 0 : index
    %c0_0 = arith.constant 0 : index
    %0 = vector.load %arg1[%c0, %c0_0] : memref<16x128xf32, #tpu.memory_space<vmem>>, vector<16x128xf32>
    %c0_1 = arith.constant 0 : index
    %c0_2 = arith.constant 0 : index
    %1 = vector.load %arg2[%c0_1, %c0_2] : memref<128x128xf32, #tpu.memory_space<vmem>>, vector<128x128xf32>
    %cst = arith.constant dense<0.000000e+00> : vector<16x128xf32>
    %2 = tpu.matmul %0, %1, %cst {dimension_numbers = #tpu.dot_dimension_numbers<[1], [0], [0], [1], [0, 0, 1, 1], [], []>, precision = #tpu.contract_precision<fp32>} : vector<16x128xf32>, vector<128x128xf32>, vector<16x128xf32> -> vector<16x128xf32>
    %c0_3 = arith.constant 0 : index
    %c0_4 = arith.constant 0 : index
    %3 = vector.load %arg3[%c0_3, %c0_4] : memref<1x128xf32, #tpu.memory_space<vmem>>, vector<1x128xf32>
    %4 = vector.broadcast %3 : vector<1x128xf32> to vector<16x128xf32>
    %5 = arith.addf %2, %4 : vector<16x128xf32>
    %cst_5 = arith.constant 0.000000e+00 : f32
    %6 = vector.broadcast %cst_5 : f32 to vector<16x128xf32>
    %7 = arith.maximumf %5, %6 : vector<16x128xf32>
    %c0_6 = arith.constant 0 : index
    %c0_7 = arith.constant 0 : index
    %8 = vector.load %arg4[%c0_6, %c0_7] : memref<128x128xf32, #tpu.memory_space<vmem>>, vector<128x128xf32>
    %cst_8 = arith.constant dense<0.000000e+00> : vector<16x128xf32>
    %9 = tpu.matmul %7, %8, %cst_8 {dimension_numbers = #tpu.dot_dimension_numbers<[1], [0], [0], [1], [0, 0, 1, 1], [], []>, precision = #tpu.contract_precision<fp32>} : vector<16x128xf32>, vector<128x128xf32>, vector<16x128xf32> -> vector<16x128xf32>
    %c0_9 = arith.constant 0 : index
    %c0_10 = arith.constant 0 : index
    %10 = vector.load %arg5[%c0_9, %c0_10] : memref<1x128xf32, #tpu.memory_space<vmem>>, vector<1x128xf32>
    %11 = vector.broadcast %10 : vector<1x128xf32> to vector<16x128xf32>
    %12 = arith.addf %9, %11 : vector<16x128xf32>
    %cst_11 = arith.constant 0.000000e+00 : f32
    %13 = vector.broadcast %cst_11 : f32 to vector<16x128xf32>
    %14 = arith.maximumf %12, %13 : vector<16x128xf32>
    %c0_12 = arith.constant 0 : index
    %c0_13 = arith.constant 0 : index
    %15 = vector.load %arg6[%c0_12, %c0_13] : memref<128x128xf32, #tpu.memory_space<vmem>>, vector<128x128xf32>
    %cst_14 = arith.constant dense<0.000000e+00> : vector<16x128xf32>
    %16 = tpu.matmul %14, %15, %cst_14 {dimension_numbers = #tpu.dot_dimension_numbers<[1], [0], [0], [1], [0, 0, 1, 1], [], []>, precision = #tpu.contract_precision<fp32>} : vector<16x128xf32>, vector<128x128xf32>, vector<16x128xf32> -> vector<16x128xf32>
    %c0_15 = arith.constant 0 : index
    %c0_16 = arith.constant 0 : index
    %17 = vector.load %arg7[%c0_15, %c0_16] : memref<1x128xf32, #tpu.memory_space<vmem>>, vector<1x128xf32>
    %18 = vector.broadcast %17 : vector<1x128xf32> to vector<16x128xf32>
    %19 = arith.addf %16, %18 : vector<16x128xf32>
    %cst_17 = arith.constant 0.000000e+00 : f32
    %20 = vector.broadcast %cst_17 : f32 to vector<16x128xf32>
    %21 = arith.maximumf %19, %20 : vector<16x128xf32>
    %c0_18 = arith.constant 0 : index
    %c0_19 = arith.constant 0 : index
    %22 = vector.load %arg8[%c0_18, %c0_19] : memref<16x128xf32, #tpu.memory_space<vmem>>, vector<16x128xf32>
    tpu.vector_store %arg8[%c0_18, %c0_19], %21 {strides = array<i32>} : memref<16x128xf32, #tpu.memory_space<vmem>>, vector<16x128xf32>,
    return
  }
  func.func @transform_0(%arg0: i32) -> (i32, i32) {
    %c0_i32 = arith.constant 0 : i32
    %c0_i32_0 = arith.constant 0 : i32
    return %arg0, %c0_i32 : i32, i32
  }
  func.func @transform_1(%arg0: i32) -> (i32, i32) {
    %c0_i32 = arith.constant 0 : i32
    %c0_i32_0 = arith.constant 0 : i32
    %c0_i32_1 = arith.constant 0 : i32
    return %c0_i32, %c0_i32_0 : i32, i32
  }
  func.func @transform_2(%arg0: i32) -> (i32, i32) {
    %c0_i32 = arith.constant 0 : i32
    %c0_i32_0 = arith.constant 0 : i32
    %c0_i32_1 = arith.constant 0 : i32
    return %c0_i32, %c0_i32_0 : i32, i32
  }
  func.func @transform_3(%arg0: i32) -> (i32, i32) {
    %c0_i32 = arith.constant 0 : i32
    %c0_i32_0 = arith.constant 0 : i32
    %c0_i32_1 = arith.constant 0 : i32
    return %c0_i32, %c0_i32_0 : i32, i32
  }
  func.func @transform_4(%arg0: i32) -> (i32, i32) {
    %c0_i32 = arith.constant 0 : i32
    %c0_i32_0 = arith.constant 0 : i32
    %c0_i32_1 = arith.constant 0 : i32
    return %c0_i32, %c0_i32_0 : i32, i32
  }
  func.func @transform_5(%arg0: i32) -> (i32, i32) {
    %c0_i32 = arith.constant 0 : i32
    %c0_i32_0 = arith.constant 0 : i32
    %c0_i32_1 = arith.constant 0 : i32
    return %c0_i32, %c0_i32_0 : i32, i32
  }
  func.func @transform_6(%arg0: i32) -> (i32, i32) {
    %c0_i32 = arith.constant 0 : i32
    %c0_i32_0 = arith.constant 0 : i32
    %c0_i32_1 = arith.constant 0 : i32
    return %c0_i32, %c0_i32_0 : i32, i32
  }
  func.func @transform_7(%arg0: i32) -> (i32, i32) {
    %c0_i32 = arith.constant 0 : i32
    %c0_i32_0 = arith.constant 0 : i32
    return %arg0, %c0_i32 : i32, i32
  }
}

</mosaic_0001>

<bundles_post_ra>
// kernel: _subnet_forward_impl.2
= control target key start
LH: loop header
LB: loop body
LE: loop exit
PB: predicated region body
PF: predicated region fallthrough
CT: control target
= control target key end

     0   :  { %s2259_s0 = inlined_call_operand.hbm [shape: f32[128,128], index: 0, kind: input, shape index: {}]   ;;  %s2260_s1 = inlined_call_operand.vmem [shape: f32[1,128], index: 1, kind: input, shape index: {}]   ;;  %s2261_s2 = inlined_call_operand.hbm [shape: f32[128,128], index: 2, kind: input, shape index: {}]   ;;  %s2262_s3 = inlined_call_operand.vmem [shape: f32[1,128], index: 3, kind: input, shape index: {}]   ;;  %s2263_s4 = inlined_call_operand.hbm [shape: f32[128,128], index: 4, kind: input, shape index: {}]   ;;  %s2264_s5 = inlined_call_operand.vmem [shape: f32[1,128], index: 5, kind: input, shape index: {}]   ;;  %s2265_s6 = inlined_call_operand.hbm [shape: f32[10,20], index: 6, kind: input, shape index: {}]   ;;  %s2266_s7 = inlined_call_operand.<no memory space> [shape: f32[], index: 7, kind: input, shape index: {}]   ;;  %s2267_s8 = inlined_call_operand.hbm [shape: f32[16,128], index: 8, kind: output, shape index: {}]  }
   0x1   :  { %v1554_v0 = vstv %s2266_s7 }
   0x2   :  { %14 = vsyncpa [#allocation8], 0 }
   0x3   :  { %15 = vsyncpa [#allocation11], 0 }
   0x4   :  { %16 = vsyncpa [#allocation14], 0 }
   0x5   :  { %17 = vsyncpa [#allocation9], 0  ;;  %s35_s9 = sshll.u32 %s2259_s0, 4  ;;  %s1499_s10 = smov [#allocation10]   ;;  %s36_s9 = int_to_ptr.hbm [resolvable:$true] %s35_s9 }
   0x6   :  { %s37_s11 = sshll.u32 %s1499_s10, 4  ;;  %s22_s14 = sshll.u32 %s2265_s6, 4  ;;  %s38_s11 = int_to_ptr.vmem [resolvable:$true] %s37_s11  ;;  %s23_s14 = int_to_ptr.hbm [resolvable:$true] %s22_s14 }
   0x7   :  { %s1500_s15 = smov 128   ;;  %s1501_s16 = smov 8  }
   0x8   :  { %43 = dma.hbm_to_vmem [thread:$0]  %s36_s9, 2048, %s38_s11, [#allocation11], %s1500_s15, %s1500_s15, %s1501_s16  }
   0x9   :  { %s1502_s7 = smov [#allocation7]   ;;  %s50_s0 = sshll.u32 %s2261_s2, 4  ;;  %s51_s0 = int_to_ptr.hbm [resolvable:$true] %s50_s0 }
   0xa   :  { %s24_s17 = sshll.u32 %s1502_s7, 4  ;;  %s65_s21 = sshll.u32 %s2263_s4, 4  ;;  %s25_s17 = int_to_ptr.vmem [resolvable:$true] %s24_s17  ;;  %s66_s21 = int_to_ptr.hbm [resolvable:$true] %s65_s21 }
   0xb   :  { %30 = dma.hbm_to_vmem [thread:$0]  %s23_s14, 256, %s25_s17, [#allocation8], %s1500_s15, %s1500_s15, %s1501_s16  }
   0xc   :  { %s1503_s22 = smov [#allocation12]   ;;  %s1504_s24 = smov [#allocation13]  }
   0xd   :  { %s52_s23 = sshll.u32 %s1503_s22, 4  ;;  %s67_s2 = sshll.u32 %s1504_s24, 4  ;;  %s53_s23 = int_to_ptr.vmem [resolvable:$true] %s52_s23  ;;  %s68_s2 = int_to_ptr.vmem [resolvable:$true] %s67_s2 }
   0xe   :  { %58 = dma.hbm_to_vmem [thread:$0]  %s51_s0, 2048, %s53_s23, [#allocation11], %s1500_s15, %s1500_s15, %s1501_s16  }
   0xf   :  { %73 = dma.hbm_to_vmem [thread:$0]  %s66_s21, 2048, %s68_s2, [#allocation14], %s1500_s15, %s1500_s15, %s1501_s16  }
  0x10   :  { %1491 = dma.done.wait [#allocation8], 256  }
  0x11   :  { %1492 = vsyncadd [#allocation8], 4294967040 }
  0x12   :  { %1493 = dma.done.wait [#allocation11], 4096  }
  0x13   :  { %1494 = vsyncadd [#allocation11], 4294963200 }
  0x14   :  { %1495 = dma.done.wait [#allocation14], 2048  }
  0x15   :  { %1496 = vsyncadd [#allocation14], 4294965248  ;;  %v139_v1 = vld [vmem:[#allocation10 + $0x78] sm:$0xff]  ;;  %v138_v2 = vld [vmem:[#allocation10 + $0x70] sm:$0xff]  ;;  %v98_v56 = vlaneseq  ;;  %s1314_s9 = sshll.u32 %s2267_s8, 4  ;;  %s1315_s9 = int_to_ptr.hbm [resolvable:$true] %s1314_s9 }
  0x16   :  { %v137_v3 = vld [vmem:[#allocation10 + $0x68] sm:$0xff]  ;;  %v1580_v4 = vand.u32 4294901760, %v139_v1  ;;  %v1582_v5 = vand.u32 4294901760, %v138_v2  ;;  %v136_v7 = vld [vmem:[#allocation10 + $0x60] sm:$0xff]  ;;  %v135_v8 = vld [vmem:[#allocation10 + $0x58] sm:$0xff] }
  0x17   :  { %v1584_v6 = vand.u32 4294901760, %v137_v3  ;;  %v134_v9 = vld [vmem:[#allocation10 + $0x50] sm:$0xff]  ;;  %v1586_v10 = vand.u32 4294901760, %v136_v7  ;;  %v1588_v11 = vand.u32 4294901760, %v135_v8  ;;  %v133_v13 = vld [vmem:[#allocation10 + $0x48] sm:$0xff]  ;;  %v132_v14 = vld [vmem:[#allocation10 + $0x40] sm:$0xff] }
  0x18   :  { %v1590_v12 = vand.u32 4294901760, %v134_v9  ;;  %145 = vmatpush.msra.mxu0 %v1580_v4  ;;  %v1594_v15 = vsub.f32 %v139_v1, %v1580_v4  ;;  %v1597_v16 = vsub.f32 %v138_v2, %v1582_v5  ;;  %v1599_v17 = vand.u32 4294901760, %v133_v13  ;;  %v131_v19 = vld [vmem:[#allocation10 + $0x38] sm:$0xff]  ;;  %358 = vmatpush.msra.mxu3 %v1580_v4  ;;  %v130_v26 = vld [vmem:[#allocation10 + $0x30] sm:$0xff]  ;;  %v129_v36 = vld [vmem:[#allocation10 + $0x28] sm:$0xff] }
  0x19   :  { %v1602_v18 = vsub.f32 %v137_v3, %v1584_v6  ;;  %v1606_v20 = vsub.f32 %v136_v7, %v1586_v10  ;;  %v1609_v21 = vsub.f32 %v135_v8, %v1588_v11  ;;  %v1615_v25 = vand.u32 4294901760, %v132_v14  ;;  %v128_v41 = vld [vmem:[#allocation10 + $0x20] sm:$0xff]  ;;  %v127_v49 = vld [vmem:[#allocation10 + $0x18] sm:$0xff]  ;;  %v126_v53 = vld [vmem:[#allocation10 + $0x10] sm:$0xff] }
  0x1a   :  { %147 = vmatpush.msra.mxu0 %v1582_v5  ;;  %v195_v22 = vand.u32 4294901760, %v1594_v15  ;;  %v201_v23 = vand.u32 4294901760, %v1597_v16  ;;  %300 = vmatpush.msra.mxu2 %v1594_v15  ;;  %v1619_v28 = vand.u32 4294901760, %v131_v19  ;;  %v1623_v30 = vsub.f32 %v134_v9, %v1590_v12  ;;  %v125_v60 = vld [vmem:[#allocation10 + $0x8] sm:$0xff]  ;;  %v124_v9 = vld [vmem:[#allocation10] sm:$0xff] }
  0x1b   :  { %v207_v24 = vand.u32 4294901760, %v1602_v18  ;;  %v213_v27 = vand.u32 4294901760, %v1606_v20  ;;  %v219_v29 = vand.u32 4294901760, %v1609_v21  ;;  %360 = vmatpush.msra.mxu3 %v1582_v5  ;;  %v1637_v34 = vsub.f32 %v133_v13, %v1599_v17 }
  0x1c   :  { %149 = vmatpush.msra.mxu0 %v1584_v6  ;;  %v196_v31 = vsub.f32 %v1594_v15, %v195_v22  ;;  %v202_v32 = vsub.f32 %v1597_v16, %v201_v23  ;;  %v1639_v35 = vand.u32 4294901760, %v130_v26  ;;  %303 = vmatpush.msra.mxu2 %v1597_v16  ;;  %v225_v40 = vand.u32 4294901760, %v1623_v30  ;;  %v532_v16 = vld [vmem:[#allocation12 + $0x70] sm:$0xff] }
  0x1d   :  { %v208_v33 = vsub.f32 %v1602_v18, %v207_v24  ;;  %362 = vmatpush.msra.mxu3 %v1584_v6  ;;  %v214_v39 = vsub.f32 %v1606_v20, %v213_v27  ;;  %v231_v42 = vand.u32 4294901760, %v1637_v34  ;;  %v1650_v43 = vsub.f32 %v132_v14, %v1615_v25 }
  0x1e   :  { %151 = vmatpush.msra.mxu0 %v1586_v10  ;;  %v197_v37 = vand.u32 4294901760, %v196_v31  ;;  %v203_v38 = vand.u32 4294901760, %v202_v32  ;;  %306 = vmatpush.msra.mxu2 %v1602_v18  ;;  %v220_v45 = vsub.f32 %v1609_v21, %v219_v29  ;;  %v1658_v46 = vand.u32 4294901760, %v129_v36  ;;  %v531_v18 = vld [vmem:[#allocation12 + $0x68] sm:$0xff] }
  0x1f   :  { %364 = vmatpush.msra.mxu3 %v1586_v10  ;;  %v209_v44 = vand.u32 4294901760, %v208_v33  ;;  %v1661_v47 = vsub.f32 %v131_v19, %v1619_v28  ;;  %v1663_v48 = vand.u32 4294901760, %v128_v41  ;;  %v215_v50 = vand.u32 4294901760, %v214_v39 }
  0x20   :  { %153 = vmatpush.msra.mxu0 %v1588_v11  ;;  %198 = vmatpush.msra.mxu1 %v197_v37  ;;  %v226_v51 = vsub.f32 %v1623_v30, %v225_v40  ;;  %v237_v52 = vand.u32 4294901760, %v1650_v43  ;;  %v1673_v54 = vsub.f32 %v130_v26, %v1639_v35  ;;  %v232_v55 = vsub.f32 %v1637_v34, %v231_v42  ;;  %v92_v26 = vld [vmem:[#allocation7] sm:$0xff] }
  0x21   :  { %309 = vmatpush.msra.mxu2 %v1606_v20  ;;  %366 = vmatpush.msra.mxu3 %v1588_v11  ;;  %v221_v57 = vand.u32 4294901760, %v220_v45  ;;  %v1681_v58 = vand.u32 4294901760, %v127_v49  ;;  %v243_v59 = vand.u32 4294901760, %v1661_v47  ;;  %v1685_v61 = vsub.f32 %v129_v36, %v1658_v46  ;;  %v107_v45 = vld [vmem:[#allocation7 + $0x8] sm:$0xff] }
  0x22   :  { %155 = vmatpush.msra.mxu0 %v1590_v12  ;;  %204 = vmatpush.msra.mxu1 %v203_v38  ;;  %v1687_v62 = vand.u32 4294901760, %v126_v53  ;;  %v1691_v63 = vsub.f32 %v128_v41, %v1663_v48  ;;  %v227_v1 = vand.u32 4294901760, %v226_v51  ;;  %v238_v2 = vsub.f32 %v1650_v43, %v237_v52 }
  0x23   :  { %312 = vmatpush.msra.mxu2 %v1609_v21  ;;  %368 = vmatpush.msra.mxu3 %v1590_v12  ;;  %v249_v3 = vand.u32 4294901760, %v1673_v54  ;;  %v233_v7 = vand.u32 4294901760, %v232_v55  ;;  %v1699_v8 = vand.u32 4294901760, %v125_v60  ;;  %v244_v13 = vsub.f32 %v1661_v47, %v243_v59 }
  0x24   :  { %157 = vmatpush.msra.mxu0 %v1599_v17  ;;  %210 = vmatpush.msra.mxu1 %v209_v44  ;;  %v255_v14 = vand.u32 4294901760, %v1685_v61  ;;  %v1709_v19 = vsub.f32 %v127_v49, %v1681_v58  ;;  %v99_v31 = vand.u32 127, %v98_v56  ;;  %v261_v32 = vand.u32 4294901760, %v1691_v63 }
  0x25   :  { %315 = vmatpush.msra.mxu2 %v1623_v30  ;;  %370 = vmatpush.msra.mxu3 %v1599_v17  ;;  %v1714_v33 = vsub.f32 %v126_v53, %v1687_v62  ;;  %v109_v36 = vshrl.u32 %v98_v56, 7  ;;  %v239_v37 = vand.u32 4294901760, %v238_v2  ;;  %v250_v38 = vsub.f32 %v1673_v54, %v249_v3 }
  0x26   :  { %159 = vmatpush.msra.mxu0 %v1615_v25  ;;  %216 = vmatpush.msra.mxu1 %v215_v50  ;;  %v1721_v39 = vand.u32 4294901760, %v124_v9  ;;  %vm101_vm0 = vcmp.lt.s32.totalorder %v99_v31, 20  ;;  %v1725_v41 = vsub.f32 %v125_v60, %v1699_v8  ;;  %v245_v50 = vand.u32 4294901760, %v244_v13 }
  0x27   :  { %318 = vmatpush.msra.mxu2 %v1637_v34  ;;  %372 = vmatpush.msra.mxu3 %v1615_v25  ;;  %v102_v44 = vsel %vm101_vm0, %v92_v26, %v1554_v0  ;;  %v110_v49 = vadd.s32 8, %v109_v36  ;;  %v256_v51 = vsub.f32 %v1685_v61, %v255_v14  ;;  %v267_v53 = vand.u32 4294901760, %v1709_v19 }
  0x28   :  { %161 = vmatpush.msra.mxu0 %v1619_v28  ;;  %222 = vmatpush.msra.mxu1 %v221_v57  ;;  %v1735_v55 = vand.u32 4294901760, %v102_v44  ;;  %v262_v56 = vsub.f32 %v1691_v63, %v261_v32  ;;  %v273_v57 = vand.u32 4294901760, %v1714_v33  ;;  %v251_v60 = vand.u32 4294901760, %v250_v38 }
  0x29   :  { %321 = vmatpush.msra.mxu2 %v1650_v43  ;;  %374 = vmatpush.msra.mxu3 %v1619_v28  ;;  %vm111_vm1 = vcmp.lt.s32.totalorder %v110_v49, 10  ;;  %v279_v13 = vand.u32 4294901760, %v1725_v41  ;;  %v257_v36 = vand.u32 4294901760, %v256_v51  ;;  %v1809_v20 = vand.u32 4294901760, %v532_v16  ;;  %v526_v43 = vld [vmem:[#allocation12 + $0x40] sm:$0xff] }
  0x2a   :  { %163 = vmatpush.msra.mxu0 %v1639_v35  ;;  %228 = vmatpush.msra.mxu1 %v227_v1  ;;  %v1745_v1 = vsub.f32 %v124_v9, %v1721_v39  ;;  %v177_v2 = vsub.f32 %v102_v44, %v1735_v55  ;;  %v268_v9 = vsub.f32 %v1709_v19, %v267_v53  ;;  %v1811_v21 = vand.u32 4294901760, %v531_v18 }
  0x2b   :  { %324 = vmatpush.msra.mxu2 %v1661_v47  ;;  %376 = vmatpush.msra.mxu3 %v1639_v35  ;;  %v274_v44 = vsub.f32 %v1714_v33, %v273_v57  ;;  %v280_v51 = vsub.f32 %v1725_v41, %v279_v13  ;;  %v1827_v30 = vsub.f32 %v532_v16, %v1809_v20 }
  0x2c   :  { %165 = vmatpush.msra.mxu0 %v1658_v46  ;;  %234 = vmatpush.msra.mxu1 %v233_v7  ;;  %v112_v7 = vsel %vm111_vm1, %v107_v45, %v1554_v0  ;;  %v285_v31 = vand.u32 4294901760, %v1745_v1  ;;  %v1830_v34 = vsub.f32 %v531_v18, %v1811_v21 }
  0x2d   :  { %327 = vmatpush.msra.mxu2 %v1673_v54  ;;  %378 = vmatpush.msra.mxu3 %v1658_v46  ;;  %v117_v26 = vsel %vm101_vm0, %v112_v7, %v1554_v0  ;;  %v263_v0 = vand.u32 4294901760, %v262_v56  ;;  %v275_v56 = vand.u32 4294901760, %v274_v44  ;;  %v595_v47 = vand.u32 4294901760, %v1827_v30 }
  0x2e   :  { %167 = vmatpush.msra.mxu0 %v1663_v48  ;;  %240 = vmatpush.msra.mxu1 %v239_v37  ;;  %v178_v37 = vand.u32 4294901760, %v177_v2  ;;  %v1758_v38 = vand.u32 4294901760, %v117_v26 }
  0x2f   :  { %330 = vmatpush.msra.mxu2 %v1685_v61  ;;  %380 = vmatpush.msra.mxu3 %v1663_v48  ;;  %v596_v61 = vsub.f32 %v1827_v30, %v595_v47 }
  0x30   :  { %169 = vmatpush.msra.mxu0 %v1681_v58  ;;  %246 = vmatpush.msra.mxu1 %v245_v50  ;;  %v179_v45 = vsub.f32 %v177_v2, %v178_v37  ;;  %v185_v49 = vsub.f32 %v117_v26, %v1758_v38  ;;  %v269_v50 = vand.u32 4294901760, %v268_v9  ;;  %v286_v26 = vsub.f32 %v1745_v1, %v285_v31 }
  0x31   :  { %333 = vmatpush.msra.mxu2 %v1691_v63  ;;  %382 = vmatpush.msra.mxu3 %v1681_v58 }
  0x32   :  { %171 = vmatpush.msra.mxu0 %v1687_v62  ;;  %252 = vmatpush.msra.mxu1 %v251_v60  ;;  %v180_v7 = vand.u32 4294901760, %v179_v45  ;;  %v186_v60 = vand.u32 4294901760, %v185_v49  ;;  %v287_v44 = vand.u32 4294901760, %v286_v26 }
  0x33   :  { %336 = vmatpush.msra.mxu2 %v1709_v19  ;;  %384 = vmatpush.msra.mxu3 %v1687_v62 }
  0x34   :  { %173 = vmatpush.msra.mxu0 %v1699_v8  ;;  %258 = vmatpush.msra.mxu1 %v257_v36  ;;  %v281_v36 = vand.u32 4294901760, %v280_v51  ;;  %v187_v9 = vsub.f32 %v185_v49, %v186_v60 }
  0x35   :  { %339 = vmatpush.msra.mxu2 %v1714_v33  ;;  %386 = vmatpush.msra.mxu3 %v1699_v8 }
  0x36   :  { %175 = vmatpush.msra.mxu0 %v1721_v39  ;;  %264 = vmatpush.msra.mxu1 %v263_v0  ;;  %v188_v15 = vand.u32 4294901760, %v187_v9 }
  0x37   :  { %342 = vmatpush.msra.mxu2 %v1725_v41  ;;  %181 = vmatmul.f32.vlgmr.msra.gmra.mxu0 %v180_v7 }
  0x38   :  { %405 = vmatpush.msrb.mxu0 %v195_v22  ;;  %270 = vmatpush.msra.mxu1 %v269_v50  ;;  %v529_v22 = vld [vmem:[#allocation12 + $0x58] sm:$0xff] }
  0x39   :  { %345 = vmatpush.msra.mxu2 %v1745_v1  ;;  %388 = vmatpush.msra.mxu3 %v1721_v39 }
  0x3a   :  { %409 = vmatpush.msrb.mxu0 %v201_v23  ;;  %276 = vmatpush.msra.mxu1 %v275_v56  ;;  %v528_v23 = vld [vmem:[#allocation12 + $0x50] sm:$0xff] }
  0x3b   :  { %348 = vmatmul.f32.vlgmr.msra.gmra.mxu2 %v177_v2  ;;  %392 = vmatmul.f32.vlgmr.msra.gmra.mxu3 %v178_v37 }
  0x3c   :  { %413 = vmatpush.msrb.mxu0 %v207_v24  ;;  %282 = vmatpush.msra.mxu1 %v281_v36  ;;  %v1816_v24 = vand.u32 4294901760, %v529_v22 }
  0x3e   :  { %417 = vmatpush.msrb.mxu0 %v213_v27  ;;  %288 = vmatpush.msra.mxu1 %v287_v44  ;;  %v1818_v27 = vand.u32 4294901760, %v528_v23 }
  0x3f   :  { %189 = vmatmul.f32.gmra.mxu0 %v188_v15  ;;  %290 = vmatmul.f32.vlgmr.msra.gmra.mxu1 %v1735_v55 }
  0x40   :  { %421 = vmatpush.msrb.mxu0 %v219_v29  ;;  %476 = vmatpush.msrb.mxu1 %v1580_v4  ;;  %v533_v4 = vld [vmem:[#allocation12 + $0x78] sm:$0xff]  ;;  %v527_v29 = vld [vmem:[#allocation12 + $0x48] sm:$0xff] }
  0x41   :  { %v1845_v54 = vand.u32 4294901760, %v527_v29 }
  0x42   :  { %425 = vmatpush.msrb.mxu0 %v225_v40  ;;  %478 = vmatpush.msrb.mxu1 %v1582_v5  ;;  %v1807_v5 = vand.u32 4294901760, %v533_v4 }
  0x43   :  { %353 = vmatmul.f32.gmra.mxu2 %v185_v49  ;;  %398 = vmatmul.f32.gmra.mxu3 %v186_v60  ;;  %v1872_v63 = vsub.f32 %v527_v29, %v1845_v54 }
  0x44   :  { %429 = vmatpush.msrb.mxu0 %v231_v42  ;;  %480 = vmatpush.msrb.mxu1 %v1584_v6  ;;  %v530_v6 = vld [vmem:[#allocation12 + $0x60] sm:$0xff]  ;;  %v1837_v42 = vsub.f32 %v529_v22, %v1816_v24  ;;  %v521_v22 = vld [vmem:[#allocation12 + $0x18] sm:$0xff] }
  0x45   :  { %539 = vmatpush.msrb.mxu2 %v1807_v5  ;;  %v625_v33 = vand.u32 4294901760, %v1872_v63 }
  0x46   :  { %433 = vmatpush.msrb.mxu0 %v237_v52  ;;  %482 = vmatpush.msrb.mxu1 %v1586_v10  ;;  %v1814_v10 = vand.u32 4294901760, %v530_v6  ;;  %v601_v52 = vand.u32 4294901760, %v1830_v34  ;;  %v613_v37 = vand.u32 4294901760, %v1837_v42 }
  0x47   :  { %294 = vmatmul.f32.gmra.mxu1 %v1758_v38  ;;  %541 = vmatpush.msrb.mxu2 %v1809_v20 }
  0x48   :  { %437 = vmatpush.msrb.mxu0 %v243_v59  ;;  %484 = vmatpush.msrb.mxu1 %v1588_v11  ;;  %v1824_v11 = vsub.f32 %v533_v4, %v1807_v5  ;;  %v1833_v40 = vsub.f32 %v530_v6, %v1814_v10  ;;  %v602_v2 = vsub.f32 %v1830_v34, %v601_v52 }
  0x49   :  { %543 = vmatpush.msrb.mxu2 %v1811_v21 }
  0x4a   :  { %441 = vmatpush.msrb.mxu0 %v249_v3  ;;  %486 = vmatpush.msrb.mxu1 %v1590_v12  ;;  %v589_v12 = vand.u32 4294901760, %v1824_v11  ;;  %v607_v59 = vand.u32 4294901760, %v1833_v40  ;;  %v1850_v3 = vsub.f32 %v528_v23, %v1818_v27  ;;  %v603_v19 = vand.u32 4294901760, %v602_v2 }
  0x4b   :  { %545 = vmatpush.msrb.mxu2 %v1814_v10 }
  0x4c   :  { %445 = vmatpush.msrb.mxu0 %v255_v14  ;;  %488 = vmatpush.msrb.mxu1 %v1599_v17  ;;  %v590_v17 = vsub.f32 %v1824_v11, %v589_v12  ;;  %v1861_v14 = vand.u32 4294901760, %v526_v43  ;;  %v608_v0 = vsub.f32 %v1833_v40, %v607_v59  ;;  %v619_v45 = vand.u32 4294901760, %v1850_v3 }
  0x4d   :  { %547 = vmatpush.msrb.mxu2 %v1816_v24 }
  0x4e   :  { %449 = vmatpush.msrb.mxu0 %v261_v32  ;;  %490 = vmatpush.msrb.mxu1 %v1615_v25  ;;  %v591_v25 = vand.u32 4294901760, %v590_v17  ;;  %v597_v32 = vand.u32 4294901760, %v596_v61  ;;  %v520_v17 = vld [vmem:[#allocation12 + $0x10] sm:$0xff] }
  0x4f   :  { %549 = vmatpush.msrb.mxu2 %v1818_v27 }
  0x50   :  { %453 = vmatpush.msrb.mxu0 %v267_v53  ;;  %492 = vmatpush.msrb.mxu1 %v1619_v28  ;;  %v1883_v28 = vsub.f32 %v526_v43, %v1861_v14  ;;  %v614_v53 = vsub.f32 %v1837_v42, %v613_v37  ;;  %v1977_v43 = vand.u32 4294901760, %v521_v22 }
  0x51   :  { %592 = vmatpush.msrb.mxu3 %v591_v25  ;;  %551 = vmatpush.msrb.mxu2 %v1845_v54  ;;  %v1985_v25 = vand.u32 4294901760, %v520_v17 }
  0x52   :  { %457 = vmatpush.msrb.mxu0 %v273_v57  ;;  %494 = vmatpush.msrb.mxu1 %v1639_v35  ;;  %v609_v35 = vand.u32 4294901760, %v608_v0  ;;  %v620_v57 = vsub.f32 %v1850_v3, %v619_v45  ;;  %v631_v41 = vand.u32 4294901760, %v1883_v28  ;;  %v1983_v2 = vsub.f32 %v521_v22, %v1977_v43  ;;  %v519_v0 = vld [vmem:[#allocation12 + $0x8] sm:$0xff] }
  0x53   :  { %598 = vmatpush.msrb.mxu3 %v597_v32  ;;  %553 = vmatpush.msrb.mxu2 %v1861_v14 }
  0x54   :  { %461 = vmatpush.msrb.mxu0 %v279_v13  ;;  %496 = vmatpush.msrb.mxu1 %v1658_v46  ;;  %v615_v46 = vand.u32 4294901760, %v614_v53  ;;  %v626_v13 = vsub.f32 %v1872_v63, %v625_v33  ;;  %v621_v49 = vand.u32 4294901760, %v620_v57  ;;  %v661_v53 = vand.u32 4294901760, %v1983_v2 }
  0x55   :  { %604 = vmatpush.msrb.mxu3 %v603_v19  ;;  %v518_v19 = vld [vmem:[#allocation12] sm:$0xff]  ;;  %v1992_v57 = vand.u32 4294901760, %v519_v0 }
  0x56   :  { %465 = vmatpush.msrb.mxu0 %v285_v31  ;;  %498 = vmatpush.msrb.mxu1 %v1663_v48  ;;  %v632_v48 = vsub.f32 %v1883_v28, %v631_v41 }
  0x57   :  { %467 = vmatmul.f32.vlgmr.msrb.gmra.mxu0 %v1735_v55  ;;  %610 = vmatpush.msrb.mxu3 %v609_v35  ;;  %v666_v35 = vsub.f32 %v520_v17, %v1985_v25 }
  0x58   :  { %500 = vmatpush.msrb.mxu1 %v1681_v58  ;;  %694 = vmatpush.msra.mxu0 %v1824_v11  ;;  %v627_v58 = vand.u32 4294901760, %v626_v13  ;;  %v633_v1 = vand.u32 4294901760, %v632_v48  ;;  %v662_v13 = vsub.f32 %v1983_v2, %v661_v53  ;;  %v672_v48 = vsub.f32 %v519_v0, %v1992_v57 }
  0x59   :  { %616 = vmatpush.msrb.mxu3 %v615_v46  ;;  %v1994_v46 = vand.u32 4294901760, %v518_v19 }
  0x5a   :  { %502 = vmatpush.msrb.mxu1 %v1687_v62  ;;  %697 = vmatpush.msra.mxu0 %v1827_v30  ;;  %v525_v62 = vld [vmem:[#allocation12 + $0x38] sm:$0xff] }
  0x5b   :  { %622 = vmatpush.msrb.mxu3 %v621_v49  ;;  %v667_v49 = vand.u32 4294901760, %v666_v35 }
  0x5c   :  { %504 = vmatpush.msrb.mxu1 %v1699_v8  ;;  %700 = vmatpush.msra.mxu0 %v1830_v34  ;;  %v524_v8 = vld [vmem:[#allocation12 + $0x30] sm:$0xff] }
  0x5d   :  { %628 = vmatpush.msrb.mxu3 %v627_v58  ;;  %v1935_v31 = vand.u32 4294901760, %v524_v8  ;;  %v678_v58 = vsub.f32 %v518_v19, %v1994_v46 }
  0x5e   :  { %506 = vmatpush.msrb.mxu1 %v1721_v39  ;;  %703 = vmatpush.msra.mxu0 %v1833_v40  ;;  %v523_v39 = vld [vmem:[#allocation12 + $0x28] sm:$0xff] }
  0x5f   :  { %471 = vmatmul.f32.gmra.mxu0 %v1758_v38  ;;  %508 = vmatmul.f32.vlgmr.msrb.gmra.mxu1 %v1735_v55  ;;  %v1933_v55 = vand.u32 4294901760, %v525_v62  ;;  %v1937_v50 = vand.u32 4294901760, %v523_v39  ;;  %v1945_v60 = vsub.f32 %v524_v8, %v1935_v31  ;;  %v673_v8 = vand.u32 4294901760, %v672_v48 }
  0x60   :  { %752 = vmatpush.msra.mxu1 %v1807_v5  ;;  %706 = vmatpush.msra.mxu0 %v1837_v42 }
  0x61   :  { %634 = vmatpush.msrb.mxu3 %v633_v1  ;;  %v1942_v7 = vsub.f32 %v525_v62, %v1933_v55  ;;  %v1948_v56 = vsub.f32 %v523_v39, %v1937_v50  ;;  %555 = vmatpush.msrb.mxu2 %v1933_v55  ;;  %v643_v9 = vand.u32 4294901760, %v1945_v60  ;;  %v663_v1 = vand.u32 4294901760, %v662_v13 }
  0x62   :  { %754 = vmatpush.msra.mxu1 %v1809_v20  ;;  %709 = vmatpush.msra.mxu0 %v1850_v3  ;;  %v668_v62 = vsub.f32 %v666_v35, %v667_v49  ;;  %v679_v39 = vand.u32 4294901760, %v678_v58 }
  0x63   :  { %v637_v36 = vand.u32 4294901760, %v1942_v7  ;;  %v649_v44 = vand.u32 4294901760, %v1948_v56  ;;  %557 = vmatpush.msrb.mxu2 %v1935_v31  ;;  %v644_v16 = vsub.f32 %v1945_v60, %v643_v9 }
  0x64   :  { %756 = vmatpush.msra.mxu1 %v1811_v21  ;;  %712 = vmatpush.msra.mxu0 %v1872_v63 }
  0x65   :  { %v638_v4 = vsub.f32 %v1942_v7, %v637_v36  ;;  %v650_v18 = vsub.f32 %v1948_v56, %v649_v44  ;;  %559 = vmatpush.msrb.mxu2 %v1937_v50  ;;  %v645_v29 = vand.u32 4294901760, %v644_v16  ;;  %v680_v16 = vsub.f32 %v678_v58, %v679_v39 }
  0x66   :  { %758 = vmatpush.msra.mxu1 %v1814_v10  ;;  %715 = vmatpush.msra.mxu0 %v1883_v28 }
  0x67   :  { %512 = vmatmul.f32.gmra.mxu1 %v1758_v38  ;;  %v522_v38 = vld [vmem:[#allocation12 + $0x20] sm:$0xff]  ;;  %v639_v23 = vand.u32 4294901760, %v638_v4  ;;  %v651_v61 = vand.u32 4294901760, %v650_v18  ;;  %v674_v4 = vsub.f32 %v672_v48, %v673_v8 }
  0x68   :  { %760 = vmatpush.msra.mxu1 %v1816_v24  ;;  %v1939_v51 = vand.u32 4294901760, %v522_v38  ;;  %718 = vmatpush.msra.mxu0 %v1942_v7  ;;  %v925_v7 = vld [vmem:[#allocation13 + $0x68] sm:$0xff] }
  0x69   :  { %640 = vmatpush.msrb.mxu3 %v639_v23  ;;  %v675_v18 = vand.u32 4294901760, %v674_v4 }
  0x6a   :  { %762 = vmatpush.msra.mxu1 %v1818_v27  ;;  %v1953_v26 = vsub.f32 %v522_v38, %v1939_v51  ;;  %721 = vmatpush.msra.mxu0 %v1945_v60  ;;  %v669_v38 = vand.u32 4294901760, %v668_v62 }
  0x6b   :  { %561 = vmatpush.msrb.mxu2 %v1939_v51  ;;  %646 = vmatpush.msrb.mxu3 %v645_v29 }
  0x6c   :  { %764 = vmatpush.msra.mxu1 %v1845_v54  ;;  %v655_v15 = vand.u32 4294901760, %v1953_v26  ;;  %724 = vmatpush.msra.mxu0 %v1948_v56 }
  0x6d   :  { %563 = vmatpush.msrb.mxu2 %v1977_v43  ;;  %652 = vmatpush.msrb.mxu3 %v651_v61 }
  0x6e   :  { %766 = vmatpush.msra.mxu1 %v1861_v14  ;;  %v656_v6 = vsub.f32 %v1953_v26, %v655_v15  ;;  %727 = vmatpush.msra.mxu0 %v1953_v26 }
  0x6f   :  { %565 = vmatpush.msrb.mxu2 %v1985_v25 }
  0x70   :  { %768 = vmatpush.msra.mxu1 %v1933_v55  ;;  %v657_v32 = vand.u32 4294901760, %v656_v6  ;;  %730 = vmatpush.msra.mxu0 %v1983_v2  ;;  %v681_v6 = vand.u32 4294901760, %v680_v16 }
  0x71   :  { %567 = vmatpush.msrb.mxu2 %v1992_v57 }
  0x72   :  { %770 = vmatpush.msra.mxu1 %v1935_v31  ;;  %733 = vmatpush.msra.mxu0 %v666_v35 }
  0x73   :  { %658 = vmatpush.msrb.mxu3 %v657_v32  ;;  %569 = vmatpush.msrb.mxu2 %v1994_v46 }
  0x74   :  { %772 = vmatpush.msra.mxu1 %v1937_v50  ;;  %736 = vmatpush.msra.mxu0 %v672_v48 }
  0x75   :  { %799 = vmatpush.msra.mxu2 %v589_v12  ;;  %664 = vmatpush.msrb.mxu3 %v663_v1 }
  0x76   :  { %774 = vmatpush.msra.mxu1 %v1939_v51  ;;  %739 = vmatpush.msra.mxu0 %v678_v58 }
  0x77   :  { %803 = vmatpush.msra.mxu2 %v595_v47  ;;  %670 = vmatpush.msrb.mxu3 %v669_v38 }
  0x78   :  { %776 = vmatpush.msra.mxu1 %v1977_v43 }
  0x79   :  { %807 = vmatpush.msra.mxu2 %v601_v52  ;;  %676 = vmatpush.msrb.mxu3 %v675_v18 }
  0x7a   :  { %778 = vmatpush.msra.mxu1 %v1985_v25 }
  0x7b   :  { %811 = vmatpush.msra.mxu2 %v607_v59  ;;  %682 = vmatpush.msrb.mxu3 %v681_v6 }
  0x7c   :  { %780 = vmatpush.msra.mxu1 %v1992_v57 }
  0x7d   :  { %870 = vmatpush.msra.mxu3 %v1807_v5  ;;  %815 = vmatpush.msra.mxu2 %v613_v37 }
  0x7e   :  { %782 = vmatpush.msra.mxu1 %v1994_v46 }
  0x7f   :  { %872 = vmatpush.msra.mxu3 %v1809_v20  ;;  %819 = vmatpush.msra.mxu2 %v619_v45 }
  0x81   :  { %874 = vmatpush.msra.mxu3 %v1811_v21  ;;  %823 = vmatpush.msra.mxu2 %v625_v33  ;;  %v1368_v21 = vld [vmem:[%s2260_s1] ss:$0 sm:$0xff] }
  0x83   :  { %876 = vmatpush.msra.mxu3 %v1814_v10  ;;  %827 = vmatpush.msra.mxu2 %v631_v41 }
  0x85   :  { %878 = vmatpush.msra.mxu3 %v1816_v24  ;;  %831 = vmatpush.msra.mxu2 %v637_v36  ;;  %v2057_v36 = vand.u32 4294901760, %v925_v7 }
  0x87   :  { %880 = vmatpush.msra.mxu3 %v1818_v27  ;;  %835 = vmatpush.msra.mxu2 %v643_v9  ;;  %v924_v9 = vld [vmem:[#allocation13 + $0x60] sm:$0xff]  ;;  %v994_v61 = vsub.f32 %v925_v7, %v2057_v36 }
  0x88   :  { %v2059_v23 = vand.u32 4294901760, %v924_v9 }
  0x89   :  { %882 = vmatpush.msra.mxu3 %v1845_v54  ;;  %839 = vmatpush.msra.mxu2 %v649_v44  ;;  %v923_v44 = vld [vmem:[#allocation13 + $0x58] sm:$0xff]  ;;  %v2074_v35 = vand.u32 4294901760, %v994_v61 }
  0x8a   :  { %v2061_v29 = vand.u32 4294901760, %v923_v44  ;;  %v1000_v32 = vsub.f32 %v924_v9, %v2059_v23 }
  0x8b   :  { %884 = vmatpush.msra.mxu3 %v1861_v14  ;;  %843 = vmatpush.msra.mxu2 %v655_v15  ;;  %v996_v58 = vsub.f32 %v994_v61, %v2074_v35 }
  0x8c   :  { %v1006_v0 = vsub.f32 %v923_v44, %v2061_v29  ;;  %v2078_v13 = vand.u32 4294901760, %v1000_v32 }
  0x8d   :  { %886 = vmatpush.msra.mxu3 %v1933_v55  ;;  %847 = vmatpush.msra.mxu2 %v661_v53  ;;  %v997_v16 = vand.u32 4294901760, %v996_v58 }
  0x8e   :  { %v2083_v1 = vand.u32 4294901760, %v1006_v0  ;;  %v1002_v38 = vsub.f32 %v1000_v32, %v2078_v13 }
  0x8f   :  { %888 = vmatpush.msra.mxu3 %v1935_v31  ;;  %851 = vmatpush.msra.mxu2 %v667_v49 }
  0x90   :  { %v1008_v18 = vsub.f32 %v1006_v0, %v2083_v1 }
  0x91   :  { %890 = vmatpush.msra.mxu3 %v1937_v50  ;;  %855 = vmatpush.msra.mxu2 %v673_v8  ;;  %v927_v50 = vld [vmem:[#allocation13 + $0x78] sm:$0xff] }
  0x92   :  { %v2053_v56 = vand.u32 4294901760, %v927_v50 }
  0x93   :  { %892 = vmatpush.msra.mxu3 %v1939_v51  ;;  %859 = vmatpush.msra.mxu2 %v679_v39  ;;  %v926_v51 = vld [vmem:[#allocation13 + $0x70] sm:$0xff] }
  0x94   :  { %v2055_v26 = vand.u32 4294901760, %v926_v51  ;;  %933 = vmatpush.msrb.mxu0 %v2053_v56 }
  0x95   :  { %894 = vmatpush.msra.mxu3 %v1977_v43  ;;  %v982_v43 = vsub.f32 %v927_v50, %v2053_v56 }
  0x96   :  { %v988_v17 = vsub.f32 %v926_v51, %v2055_v26  ;;  %935 = vmatpush.msrb.mxu0 %v2055_v26 }
  0x97   :  { %896 = vmatpush.msra.mxu3 %v1985_v25  ;;  %v2070_v19 = vand.u32 4294901760, %v982_v43 }
  0x98   :  { %v2072_v53 = vand.u32 4294901760, %v988_v17  ;;  %937 = vmatpush.msrb.mxu0 %v2057_v36 }
  0x99   :  { %898 = vmatpush.msra.mxu3 %v1992_v57  ;;  %v984_v49 = vsub.f32 %v982_v43, %v2070_v19 }
  0x9a   :  { %v990_v48 = vsub.f32 %v988_v17, %v2072_v53  ;;  %939 = vmatpush.msrb.mxu0 %v2059_v23 }
  0x9b   :  { %900 = vmatpush.msra.mxu3 %v1994_v46  ;;  %v985_v8 = vand.u32 4294901760, %v984_v49 }
  0x9c   :  { %v991_v39 = vand.u32 4294901760, %v990_v48  ;;  %941 = vmatpush.msrb.mxu0 %v2061_v29 }
  0x9d   :  { %986 = vmatpush.msrb.mxu1 %v985_v8  ;;  %v913_v8 = vld [vmem:[#allocation13 + $0x8] sm:$0xff] }
  0x9f   :  { %992 = vmatpush.msrb.mxu1 %v991_v39 }
  0xa1   :  { %998 = vmatpush.msrb.mxu1 %v997_v16 }
  0xb4   :  { %v182_v5 = vpop.f32.mrf.mxu0 }
  0xb5   :  { %v183_v24 = vadd.f32 %v1368_v21, %v182_v5  ;;  %v1003_v5 = vand.u32 4294901760, %v1002_v38 }
  0xb7   :  { %1004 = vmatpush.msrb.mxu1 %v1003_v5 }
  0xbc   :  { %v291_v20 = vpop.f32.mrf.mxu1  ;;  %v190_v10 = vpop.f32.mrf.mxu0 }
  0xbd   :  { %v292_v11 = vadd.f32 %v291_v20, %v183_v24  ;;  %v191_v40 = vadd.f32 %v1368_v21, %v190_v10  ;;  %v1009_v21 = vand.u32 4294901760, %v1008_v18  ;;  %v922_v10 = vld [vmem:[#allocation13 + $0x50] sm:$0xff]  ;;  %v2161_v18 = vand.u32 4294901760, %v913_v8 }
  0xbe   :  { %v349_v27 = vpop.f32.mrf.mxu2  ;;  %v393_v34 = vpop.f32.mrf.mxu3  ;;  %v2095_v24 = vand.u32 4294901760, %v922_v10 }
  0xbf   :  { %v350_v42 = vadd.f32 %v349_v27, %v292_v11  ;;  %1010 = vmatpush.msrb.mxu1 %v1009_v21  ;;  %v921_v27 = vld [vmem:[#allocation13 + $0x48] sm:$0xff] }
  0xc0   :  { %v1012_v11 = vsub.f32 %v922_v10, %v2095_v24  ;;  %943 = vmatpush.msrb.mxu0 %v2095_v24 }
  0xc1   :  { %v394_v47 = vadd.f32 %v393_v34, %v350_v42  ;;  %v920_v34 = vld [vmem:[#allocation13 + $0x40] sm:$0xff] }
  0xc4   :  { %v295_v30 = vpop.f32.mrf.mxu1 }
  0xc5   :  { %v296_v52 = vadd.f32 %v295_v30, %v191_v40  ;;  %v2098_v30 = vand.u32 4294901760, %v921_v27  ;;  %v2102_v40 = vand.u32 4294901760, %v1012_v11 }
  0xc6   :  { %v354_v54 = vpop.f32.mrf.mxu2  ;;  %v399_v63 = vpop.f32.mrf.mxu3 }
  0xc7   :  { %v355_v14 = vadd.f32 %v354_v54, %v296_v52  ;;  %v1018_v42 = vsub.f32 %v921_v27, %v2098_v30  ;;  %945 = vmatpush.msrb.mxu0 %v2098_v30  ;;  %v1014_v52 = vsub.f32 %v1012_v11, %v2102_v40  ;;  %v1066_v27 = vsub.f32 %v913_v8, %v2161_v18 }
  0xc9   :  { %v400_v33 = vadd.f32 %v399_v63, %v355_v14  ;;  %v2110_v54 = vand.u32 4294901760, %v1018_v42  ;;  %v918_v14 = vld [vmem:[#allocation13 + $0x30] sm:$0xff] }
  0xcb   :  { %v1020_v63 = vsub.f32 %v1018_v42, %v2110_v54 }
  0xd4   :  { %v468_v12 = vpop.f32.mrf.mxu0 }
  0xd5   :  { %v469_v59 = vadd.f32 %v468_v12, %v394_v47  ;;  %v2105_v12 = vand.u32 4294901760, %v920_v34  ;;  %v919_v47 = vld [vmem:[#allocation13 + $0x38] sm:$0xff] }
  0xd7   :  { %947 = vmatpush.msrb.mxu0 %v2105_v12 }
  0xdc   :  { %v509_v3 = vpop.f32.mrf.mxu1  ;;  %v472_v28 = vpop.f32.mrf.mxu0 }
  0xdd   :  { %v510_v37 = vadd.f32 %v509_v3, %v469_v59  ;;  %v473_v55 = vadd.f32 %v472_v28, %v400_v33  ;;  %v1024_v59 = vsub.f32 %v920_v34, %v2105_v12  ;;  %v2113_v3 = vand.u32 4294901760, %v919_v47 }
  0xde   :  { %v2122_v33 = vand.u32 4294901760, %v918_v14 }
  0xdf   :  { %v516_v45 = vmax.f32 %v510_v37, 0.0  ;;  %v1015_v37 = vand.u32 4294901760, %v1014_v52  ;;  %v1030_v28 = vsub.f32 %v919_v47, %v2113_v3  ;;  %949 = vmatpush.msrb.mxu0 %v2113_v3  ;;  %v2175_v47 = vand.u32 4294901760, %v1066_v27 }
  0xe0   :  { %v1036_v7 = vsub.f32 %v918_v14, %v2122_v33 }
  0xe1   :  { %v2049_v41 = vand.u32 4294901760, %v516_v45  ;;  %1016 = vmatpush.msrb.mxu1 %v1015_v37  ;;  %v2126_v50 = vand.u32 4294901760, %v1030_v28  ;;  %951 = vmatpush.msrb.mxu0 %v2122_v33  ;;  %v1068_v14 = vsub.f32 %v1066_v27, %v2175_v47 }
  0xe3   :  { %v571_v31 = vsub.f32 %v516_v45, %v2049_v41  ;;  %684 = vmatmul.f32.vlgmr.msrb.gmra.mxu3 %v2049_v41  ;;  %v2118_v45 = vand.u32 4294901760, %v1024_v59  ;;  %v1032_v44 = vsub.f32 %v1030_v28, %v2126_v50 }
  0xe4   :  { %v513_v60 = vpop.f32.mrf.mxu1  ;;  %1146 = vmatpush.msrb.mxu3 %v2053_v56 }
  0xe5   :  { %v514_v15 = vadd.f32 %v513_v60, %v473_v55  ;;  %742 = vmatmul.f32.vlgmr.msra.gmra.mxu0 %v571_v31  ;;  %v572_v22 = vand.u32 4294901760, %v571_v31  ;;  %v1021_v55 = vand.u32 4294901760, %v1020_v63  ;;  %v916_v60 = vld [vmem:[#allocation13 + $0x20] sm:$0xff]  ;;  %v1069_v63 = vand.u32 4294901760, %v1068_v14 }
  0xe6   :  { %1148 = vmatpush.msrb.mxu3 %v2055_v26 }
  0xe7   :  { %v517_v2 = vmax.f32 %v514_v15, 0.0  ;;  %786 = vmatmul.f32.vlgmr.msra.gmra.mxu1 %v572_v22  ;;  %v573_v25 = vsub.f32 %v571_v31, %v572_v22  ;;  %v1026_v31 = vsub.f32 %v1024_v59, %v2118_v45  ;;  %v2135_v22 = vand.u32 4294901760, %v916_v60 }
  0xe8   :  { %1150 = vmatpush.msrb.mxu3 %v2057_v36  ;;  %1022 = vmatpush.msrb.mxu1 %v1021_v55 }
  0xe9   :  { %v578_v57 = vand.u32 4294901760, %v517_v2  ;;  %v574_v46 = vand.u32 4294901760, %v573_v25  ;;  %v1027_v9 = vand.u32 4294901760, %v1026_v31  ;;  %v1048_v25 = vsub.f32 %v916_v60, %v2135_v22 }
  0xea   :  { %1152 = vmatpush.msrb.mxu3 %v2059_v23 }
  0xeb   :  { %v579_v62 = vsub.f32 %v517_v2, %v578_v57  ;;  %575 = vmatmul.f32.vlgmr.msrb.gmra.mxu2 %v574_v46  ;;  %688 = vmatmul.f32.gmra.mxu3 %v578_v57  ;;  %v2149_v49 = vand.u32 4294901760, %v1048_v25 }
  0xec   :  { %1088 = vmatpush.msrb.mxu2 %v982_v43  ;;  %1154 = vmatpush.msrb.mxu3 %v2061_v29  ;;  %v2137_v43 = vand.u32 4294901760, %v1036_v7 }
  0xed   :  { %747 = vmatmul.f32.gmra.mxu0 %v579_v62  ;;  %v580_v4 = vand.u32 4294901760, %v579_v62  ;;  %1028 = vmatpush.msrb.mxu1 %v1027_v9  ;;  %v1050_v38 = vsub.f32 %v1048_v25, %v2149_v49 }
  0xee   :  { %1091 = vmatpush.msrb.mxu2 %v988_v17  ;;  %1156 = vmatpush.msrb.mxu3 %v2095_v24  ;;  %v915_v17 = vld [vmem:[#allocation13 + $0x18] sm:$0xff] }
  0xef   :  { %792 = vmatmul.f32.gmra.mxu1 %v580_v4  ;;  %v581_v6 = vsub.f32 %v579_v62, %v580_v4  ;;  %v1051_v5 = vand.u32 4294901760, %v1050_v38 }
  0xf0   :  { %1094 = vmatpush.msrb.mxu2 %v994_v61  ;;  %1158 = vmatpush.msrb.mxu3 %v2098_v30  ;;  %v1033_v61 = vand.u32 4294901760, %v1032_v44 }
  0xf1   :  { %v582_v20 = vand.u32 4294901760, %v581_v6  ;;  %v912_v6 = vld [vmem:[#allocation13] sm:$0xff] }
  0xf2   :  { %1097 = vmatpush.msrb.mxu2 %v1000_v32  ;;  %1160 = vmatpush.msrb.mxu3 %v2105_v12  ;;  %v2143_v32 = vand.u32 4294901760, %v915_v17  ;;  %v2166_v10 = vand.u32 4294901760, %v912_v6 }
  0xf3   :  { %583 = vmatmul.f32.gmra.mxu2 %v582_v20  ;;  %902 = vmatmul.f32.vlgmr.msra.gmra.mxu3 %v2049_v41 }
  0xf4   :  { %1100 = vmatpush.msrb.mxu2 %v1006_v0  ;;  %1162 = vmatpush.msrb.mxu3 %v2113_v3  ;;  %v1038_v0 = vsub.f32 %v1036_v7, %v2137_v43  ;;  %v1054_v48 = vsub.f32 %v915_v17, %v2143_v32 }
  0xf5   :  { %1034 = vmatpush.msrb.mxu1 %v1033_v61 }
  0xf6   :  { %1103 = vmatpush.msrb.mxu2 %v1012_v11  ;;  %1164 = vmatpush.msrb.mxu3 %v2122_v33  ;;  %v1039_v62 = vand.u32 4294901760, %v1038_v0  ;;  %v2157_v4 = vand.u32 4294901760, %v1054_v48 }
  0xf8   :  { %1106 = vmatpush.msrb.mxu2 %v1018_v42  ;;  %1040 = vmatpush.msrb.mxu1 %v1039_v62  ;;  %v1056_v20 = vsub.f32 %v1054_v48, %v2157_v4  ;;  %v1072_v42 = vsub.f32 %v912_v6, %v2166_v10 }
  0xfa   :  { %1109 = vmatpush.msrb.mxu2 %v1024_v59  ;;  %v1057_v11 = vand.u32 4294901760, %v1056_v20  ;;  %v2177_v59 = vand.u32 4294901760, %v1072_v42 }
  0xfb   :  { %861 = vmatmul.f32.vlgmr.msra.gmra.mxu2 %v2049_v41  ;;  %906 = vmatmul.f32.gmra.mxu3 %v578_v57  ;;  %v917_v41 = vld [vmem:[#allocation13 + $0x28] sm:$0xff] }
  0xfc   :  { %1112 = vmatpush.msrb.mxu2 %v1030_v28  ;;  %v2128_v51 = vand.u32 4294901760, %v917_v41  ;;  %v1074_v37 = vsub.f32 %v1072_v42, %v2177_v59 }
  0xfe   :  { %v1042_v15 = vsub.f32 %v917_v41, %v2128_v51  ;;  %1115 = vmatpush.msrb.mxu2 %v1036_v7  ;;  %1166 = vmatpush.msrb.mxu3 %v2128_v51  ;;  %v1075_v28 = vand.u32 4294901760, %v1074_v37 }
  0xff   :  { %953 = vmatpush.msrb.mxu0 %v2128_v51 }
 0x100   :  { %v2140_v2 = vand.u32 4294901760, %v1042_v15  ;;  %1118 = vmatpush.msrb.mxu2 %v1042_v15  ;;  %1168 = vmatpush.msrb.mxu3 %v2135_v22 }
 0x101   :  { %955 = vmatpush.msrb.mxu0 %v2135_v22 }
 0x102   :  { %v1044_v46 = vsub.f32 %v1042_v15, %v2140_v2  ;;  %1121 = vmatpush.msrb.mxu2 %v1048_v25  ;;  %1170 = vmatpush.msrb.mxu3 %v2143_v32 }
 0x103   :  { %865 = vmatmul.f32.gmra.mxu2 %v578_v57  ;;  %v914_v57 = vld [vmem:[#allocation13 + $0x10] sm:$0xff]  ;;  %957 = vmatpush.msrb.mxu0 %v2143_v32 }
 0x104   :  { %v2152_v58 = vand.u32 4294901760, %v914_v57  ;;  %v1045_v39 = vand.u32 4294901760, %v1044_v46  ;;  %1124 = vmatpush.msrb.mxu2 %v1054_v48 }
 0x106   :  { %v1060_v16 = vsub.f32 %v914_v57, %v2152_v58  ;;  %1172 = vmatpush.msrb.mxu3 %v2152_v58  ;;  %959 = vmatpush.msrb.mxu0 %v2152_v58 }
 0x107   :  { %1046 = vmatpush.msrb.mxu1 %v1045_v39 }
 0x108   :  { %v2164_v21 = vand.u32 4294901760, %v1060_v16  ;;  %1127 = vmatpush.msrb.mxu2 %v1060_v16  ;;  %1174 = vmatpush.msrb.mxu3 %v2161_v18 }
 0x109   :  { %961 = vmatpush.msrb.mxu0 %v2161_v18  ;;  %1052 = vmatpush.msrb.mxu1 %v1051_v5 }
 0x10a   :  { %v1062_v34 = vsub.f32 %v1060_v16, %v2164_v21  ;;  %1130 = vmatpush.msrb.mxu2 %v1066_v27  ;;  %1176 = vmatpush.msrb.mxu3 %v2166_v10 }
 0x10b   :  { %963 = vmatpush.msrb.mxu0 %v2166_v10  ;;  %1058 = vmatpush.msrb.mxu1 %v1057_v11 }
 0x10c   :  { %v1063_v52 = vand.u32 4294901760, %v1062_v34  ;;  %1133 = vmatpush.msrb.mxu2 %v1072_v42  ;;  %1345 = vmatpush.msra.mxu3 %v2053_v56 }
 0x10d   :  { %1193 = vmatpush.msra.mxu0 %v2070_v19 }
 0x10e   :  { %1329 = vmatpush.msra.mxu2 %v2070_v19  ;;  %1064 = vmatpush.msrb.mxu1 %v1063_v52 }
 0x10f   :  { %1346 = vmatpush.msra.mxu3 %v2055_v26  ;;  %1197 = vmatpush.msra.mxu0 %v2072_v53 }
 0x110   :  { %1330 = vmatpush.msra.mxu2 %v2072_v53  ;;  %1070 = vmatpush.msrb.mxu1 %v1069_v63 }
 0x111   :  { %1347 = vmatpush.msra.mxu3 %v2057_v36  ;;  %1201 = vmatpush.msra.mxu0 %v2074_v35 }
 0x112   :  { %1331 = vmatpush.msra.mxu2 %v2074_v35  ;;  %1076 = vmatpush.msrb.mxu1 %v1075_v28 }
 0x113   :  { %1348 = vmatpush.msra.mxu3 %v2059_v23  ;;  %1205 = vmatpush.msra.mxu0 %v2078_v13 }
 0x114   :  { %1264 = vmatpush.msra.mxu1 %v2053_v56  ;;  %1332 = vmatpush.msra.mxu2 %v2078_v13 }
 0x115   :  { %1349 = vmatpush.msra.mxu3 %v2061_v29  ;;  %1209 = vmatpush.msra.mxu0 %v2083_v1 }
 0x116   :  { %1266 = vmatpush.msra.mxu1 %v2055_v26  ;;  %1333 = vmatpush.msra.mxu2 %v2083_v1  ;;  %v1369_v26 = vld [vmem:[%s2262_s3] ss:$0 sm:$0xff] }
 0x117   :  { %1350 = vmatpush.msra.mxu3 %v2095_v24  ;;  %1213 = vmatpush.msra.mxu0 %v2102_v40 }
 0x118   :  { %1268 = vmatpush.msra.mxu1 %v2057_v36  ;;  %1334 = vmatpush.msra.mxu2 %v2102_v40 }
 0x119   :  { %1351 = vmatpush.msra.mxu3 %v2098_v30  ;;  %1217 = vmatpush.msra.mxu0 %v2110_v54 }
 0x11a   :  { %1270 = vmatpush.msra.mxu1 %v2059_v23  ;;  %1335 = vmatpush.msra.mxu2 %v2110_v54 }
 0x11b   :  { %1352 = vmatpush.msra.mxu3 %v2105_v12  ;;  %1221 = vmatpush.msra.mxu0 %v2118_v45 }
 0x11c   :  { %1272 = vmatpush.msra.mxu1 %v2061_v29  ;;  %1336 = vmatpush.msra.mxu2 %v2118_v45 }
 0x11d   :  { %1353 = vmatpush.msra.mxu3 %v2113_v3  ;;  %1225 = vmatpush.msra.mxu0 %v2126_v50 }
 0x11e   :  { %1274 = vmatpush.msra.mxu1 %v2095_v24  ;;  %1337 = vmatpush.msra.mxu2 %v2126_v50 }
 0x11f   :  { %1354 = vmatpush.msra.mxu3 %v2122_v33  ;;  %1229 = vmatpush.msra.mxu0 %v2137_v43 }
 0x120   :  { %1276 = vmatpush.msra.mxu1 %v2098_v30  ;;  %1338 = vmatpush.msra.mxu2 %v2137_v43 }
 0x121   :  { %1355 = vmatpush.msra.mxu3 %v2128_v51  ;;  %1233 = vmatpush.msra.mxu0 %v2140_v2 }
 0x122   :  { %1278 = vmatpush.msra.mxu1 %v2105_v12  ;;  %1339 = vmatpush.msra.mxu2 %v2140_v2 }
 0x123   :  { %1356 = vmatpush.msra.mxu3 %v2135_v22  ;;  %1237 = vmatpush.msra.mxu0 %v2149_v49 }
 0x124   :  { %1280 = vmatpush.msra.mxu1 %v2113_v3  ;;  %1340 = vmatpush.msra.mxu2 %v2149_v49  ;;  %v1370_v49 = vld [vmem:[%s2264_s5] ss:$0 sm:$0xff]  ;;  %s1505_s5 = smov [#allocation15]  }
 0x125   :  { %1357 = vmatpush.msra.mxu3 %v2143_v32  ;;  %1241 = vmatpush.msra.mxu0 %v2157_v4  ;;  %s1312_s28 = sshll.u32 %s1505_s5, 4  ;;  %s1313_s28 = int_to_ptr.vmem [resolvable:$true] %s1312_s28 }
 0x126   :  { %1282 = vmatpush.msra.mxu1 %v2122_v33  ;;  %1341 = vmatpush.msra.mxu2 %v2157_v4 }
 0x127   :  { %1358 = vmatpush.msra.mxu3 %v2152_v58  ;;  %1245 = vmatpush.msra.mxu0 %v2164_v21 }
 0x128   :  { %1284 = vmatpush.msra.mxu1 %v2128_v51  ;;  %1342 = vmatpush.msra.mxu2 %v2164_v21 }
 0x129   :  { %1359 = vmatpush.msra.mxu3 %v2161_v18  ;;  %1249 = vmatpush.msra.mxu0 %v2175_v47 }
 0x12a   :  { %1286 = vmatpush.msra.mxu1 %v2135_v22  ;;  %1343 = vmatpush.msra.mxu2 %v2175_v47 }
 0x12b   :  { %1360 = vmatpush.msra.mxu3 %v2166_v10  ;;  %1253 = vmatpush.msra.mxu0 %v2177_v59 }
 0x12c   :  { %1288 = vmatpush.msra.mxu1 %v2143_v32  ;;  %1344 = vmatpush.msra.mxu2 %v2177_v59 }
 0x12e   :  { %1290 = vmatpush.msra.mxu1 %v2152_v58 }
 0x130   :  { %1292 = vmatpush.msra.mxu1 %v2161_v18 }
 0x132   :  { %1294 = vmatpush.msra.mxu1 %v2166_v10 }
 0x162   :  { %v743_v53 = vpop.f32.mrf.mxu0 }
 0x164   :  { %v787_v24 = vpop.f32.mrf.mxu1 }
 0x166   :  { %v685_v56 = vpop.f32.mrf.mxu3 }
 0x16a   :  { %v748_v45 = vpop.f32.mrf.mxu0 }
 0x16c   :  { %v793_v31 = vpop.f32.mrf.mxu1 }
 0x16e   :  { %v576_v36 = vpop.f32.mrf.mxu2  ;;  %v689_v29 = vpop.f32.mrf.mxu3 }
 0x16f   :  { %v577_v23 = vadd.f32 %v1369_v26, %v576_v36 }
 0x171   :  { %v686_v19 = vadd.f32 %v685_v56, %v577_v23 }
 0x173   :  { %v744_v1 = vadd.f32 %v743_v53, %v686_v19 }
 0x175   :  { %v788_v40 = vadd.f32 %v787_v24, %v744_v1 }
 0x176   :  { %v584_v35 = vpop.f32.mrf.mxu2  ;;  %v903_v12 = vpop.f32.mrf.mxu3 }
 0x177   :  { %v585_v13 = vadd.f32 %v1369_v26, %v584_v35 }
 0x179   :  { %v690_v30 = vadd.f32 %v689_v29, %v585_v13 }
 0x17b   :  { %v749_v41 = vadd.f32 %v748_v45, %v690_v30 }
 0x17d   :  { %v794_v51 = vadd.f32 %v793_v31, %v749_v41 }
 0x17e   :  { %v862_v54 = vpop.f32.mrf.mxu2  ;;  %v907_v44 = vpop.f32.mrf.mxu3 }
 0x17f   :  { %v863_v3 = vadd.f32 %v862_v54, %v788_v40 }
 0x181   :  { %v904_v33 = vadd.f32 %v903_v12, %v863_v3 }
 0x183   :  { %v910_v55 = vmax.f32 %v904_v33, 0.0 }
 0x185   :  { %v964_v50 = vand.u32 4294901760, %v910_v55 }
 0x186   :  { %v866_v7 = vpop.f32.mrf.mxu2 }
 0x187   :  { %v965_v60 = vsub.f32 %v910_v55, %v964_v50  ;;  %v867_v9 = vadd.f32 %v866_v7, %v794_v51  ;;  %1078 = vmatmul.f32.vlgmr.msrb.gmra.mxu1 %v964_v50 }
 0x189   :  { %v908_v15 = vadd.f32 %v907_v44, %v867_v9  ;;  %1136 = vmatmul.f32.vlgmr.msrb.gmra.mxu2 %v965_v60  ;;  %v966_v22 = vand.u32 4294901760, %v965_v60 }
 0x18b   :  { %v911_v43 = vmax.f32 %v908_v15, 0.0  ;;  %1180 = vmatmul.f32.vlgmr.msrb.gmra.mxu3 %v966_v22  ;;  %v967_v17 = vsub.f32 %v965_v60, %v966_v22 }
 0x18d   :  { %v972_v61 = vand.u32 4294901760, %v911_v43  ;;  %v968_v2 = vand.u32 4294901760, %v967_v17 }
 0x18f   :  { %969 = vmatmul.f32.vlgmr.msrb.gmra.mxu0 %v968_v2  ;;  %1082 = vmatmul.f32.gmra.mxu1 %v972_v61  ;;  %v973_v25 = vsub.f32 %v911_v43, %v972_v61 }
 0x191   :  { %1141 = vmatmul.f32.gmra.mxu2 %v973_v25  ;;  %v974_v32 = vand.u32 4294901760, %v973_v25 }
 0x193   :  { %1186 = vmatmul.f32.gmra.mxu3 %v974_v32  ;;  %v975_v0 = vsub.f32 %v973_v25, %v974_v32 }
 0x195   :  { %v976_v57 = vand.u32 4294901760, %v975_v0 }
 0x197   :  { %977 = vmatmul.f32.gmra.mxu0 %v976_v57  ;;  %1296 = vmatmul.f32.vlgmr.msra.gmra.mxu1 %v964_v50 }
 0x199   :  { %1259 = vmatmul.f32.vlgmr.msra.gmra.mxu2 %v972_v61 }
 0x19b   :  { %1300 = vmatmul.f32.vlgmr.msra.gmra.mxu3 %v972_v61 }
 0x19f   :  { %1255 = vmatmul.f32.vlgmr.msra.gmra.mxu0 %v964_v50 }
 0x204   :  { %v1079_v46 = vpop.f32.mrf.mxu1 }
 0x20c   :  { %v970_v48 = vpop.f32.mrf.mxu0  ;;  %v1137_v58 = vpop.f32.mrf.mxu2 }
 0x20d   :  { %v971_v8 = vadd.f32 %v1370_v49, %v970_v48  ;;  %v1083_v38 = vpop.f32.mrf.mxu1 }
 0x20e   :  { %v1181_v62 = vpop.f32.mrf.mxu3 }
 0x20f   :  { %v1080_v39 = vadd.f32 %v1079_v46, %v971_v8 }
 0x211   :  { %v1138_v5 = vadd.f32 %v1137_v58, %v1080_v39 }
 0x213   :  { %v1182_v10 = vadd.f32 %v1181_v62, %v1138_v5 }
 0x214   :  { %v978_v4 = vpop.f32.mrf.mxu0  ;;  %v1142_v18 = vpop.f32.mrf.mxu2 }
 0x215   :  { %v979_v16 = vadd.f32 %v1370_v49, %v978_v4  ;;  %v1297_v47 = vpop.f32.mrf.mxu1 }
 0x216   :  { %v1187_v6 = vpop.f32.mrf.mxu3 }
 0x217   :  { %v1084_v20 = vadd.f32 %v1083_v38, %v979_v16 }
 0x219   :  { %v1143_v21 = vadd.f32 %v1142_v18, %v1084_v20 }
 0x21b   :  { %v1188_v27 = vadd.f32 %v1187_v6, %v1143_v21 }
 0x21c   :  { %v1256_v11 = vpop.f32.mrf.mxu0  ;;  %v1260_v42 = vpop.f32.mrf.mxu2 }
 0x21d   :  { %v1257_v34 = vadd.f32 %v1256_v11, %v1182_v10  ;;  %v1261_v52 = vadd.f32 %v1260_v42, %v1188_v27 }
 0x21e   :  { %v1301_v59 = vpop.f32.mrf.mxu3 }
 0x21f   :  { %v1298_v14 = vadd.f32 %v1297_v47, %v1257_v34  ;;  %v1302_v37 = vadd.f32 %v1301_v59, %v1261_v52 }
 0x221   :  { %v1304_v63 = vmax.f32 %v1298_v14, 0.0  ;;  %v1305_v28 = vmax.f32 %v1302_v37, 0.0 }
 0x223   :  { %1306 = vst [vmem:[#allocation15] sm:$0xff] %v1304_v63 }
 0x224   :  { %1307 = vst [vmem:[#allocation15 + $0x8] sm:$0xff] %v1305_v28 }
 0x225   :  { %1320 = dma.vmem_to_hbm [thread:$0]  %s1313_s28, 256, %s1315_s9, [#allocation9], %s1500_s15, %s1500_s15, %s1501_s16  }
 0x226   :  { %1497 = dma.done.wait [#allocation9], 256  }
 0x227   :  { %1498 = vsyncadd [#allocation9], 4294967040 }
 0x228   :  { %1325 = vsyncpa [#allocation8], 1 }
 0x229   :  { %1326 = vsyncpa [#allocation11], 1 }
 0x22a   :  { %1327 = vsyncpa [#allocation14], 1 }
 0x22b   :  { %1328 = vsyncpa [#allocation9], 1 }

</bundles_post_ra>
